<compile_context>
chip_gen: v6e
topology: v6e:2x2x1
jax: 0.10.0
libtpu: 0.0.40
codegen_flags: <defaults>
</compile_context>

<pallas_src>
import math

import jax
import jax.numpy as jnp
from jax.experimental import pallas as pl
from jax.experimental.pallas import tpu as pltpu

_LANES = 512          # lane-dense slab width (multiple of 128)
_MAX_TILE_ROWS = 1024 # 1024 x 512 x 4B = 2 MiB per input block


def _soft_logit_kernel(out_ref, tgt_ref, part_ref):
    """Per-tile: partial[8, C] = sum over row-groups of softplus(-t * o)."""
    o = out_ref[...].astype(jnp.float32)
    t = tgt_ref[...].astype(jnp.float32)
    x = -(t * o)
    # stable softplus: log(1 + exp(x)) == max(x, 0) + log1p(exp(-|x|))
    sp = jnp.maximum(x, 0.0) + jnp.log1p(jnp.exp(-jnp.abs(x)))
    tile_r, c = sp.shape
    # reduce sublane groups with cheap VPU adds; keep an (8, C) lane-dense
    # partial per tile (better accuracy than a single running scalar).
    part_ref[0] = jnp.sum(sp.reshape(tile_r // 8, 8, c), axis=0)


def soft_logit_loss(output: jax.Array, target: jax.Array) -> jax.Array:
    # match torch: 1-D target becomes a column vector, then broadcasts
    if target.ndim == 1:
        target = target.reshape(-1, 1)

    shape = jnp.broadcast_shapes(output.shape, target.shape)
    # only materialize a broadcast copy in HBM when actually required
    # TODO(synk): a fully broadcast-free path (separate BlockSpecs per operand)
    # would need shape-specific index maps; the common (N,1)/(N,) case already
    # avoids any broadcast copy.
    if tuple(output.shape) != tuple(shape):
        output = jnp.broadcast_to(output, shape)
    if tuple(target.shape) != tuple(shape):
        target = jnp.broadcast_to(target, shape)

    n_elems = math.prod(shape) if len(shape) else 1
    out_flat = output.reshape(-1)
    tgt_flat = target.reshape(-1)

    C = _LANES
    rows_needed = max(1, pl.cdiv(n_elems, C))
    tile_r = min(_MAX_TILE_ROWS, ((rows_needed + 7) // 8) * 8)  # multiple of 8
    num_tiles = pl.cdiv(rows_needed, tile_r)
    padded_rows = num_tiles * tile_r

    pad = padded_rows * C - n_elems
    if pad:
        # neutral padding: softplus(-(1.0 * 1e30)) == 0 exactly
        out_flat = jnp.pad(out_flat, (0, pad), constant_values=1e30)
        tgt_flat = jnp.pad(tgt_flat, (0, pad), constant_values=1.0)

    out2 = out_flat.reshape(padded_rows, C)
    tgt2 = tgt_flat.reshape(padded_rows, C)

    partials = pl.pallas_call(
        _soft_logit_kernel,
        out_shape=jax.ShapeDtypeStruct((num_tiles, 8, C), jnp.float32),
        grid_spec=pltpu.PrefetchScalarGridSpec(
            num_scalar_prefetch=0,
            grid=(num_tiles,),
            in_specs=[
                pl.BlockSpec((tile_r, C), lambda i: (i, 0)),
                pl.BlockSpec((tile_r, C), lambda i: (i, 0)),
            ],
            out_specs=pl.BlockSpec((1, 8, C), lambda i: (i, 0, 0)),
        ),
        compiler_params=pltpu.CompilerParams(
            dimension_semantics=("parallel",),  # no carried state -> 2 TCs on v7x
        ),
    )(out2, tgt2)

    # tiny cross-tile reduction outside the kernel
    return jnp.sum(partials) / jnp.float32(n_elems)


if __name__ == "__main__":
    key = jax.random.PRNGKey(0)
    k1, k2, k3, k4 = jax.random.split(key, 4)

    # typical usage: (N, 1) logits, (N,) targets in {-1, +1}
    N = 256
    output = jax.random.normal(k1, (N, 1), dtype=jnp.float32)
    target = jnp.where(
        jax.random.bernoulli(k2, 0.5, (N,)), 1.0, -1.0
    ).astype(jnp.float32)

    loss = soft_logit_loss(output, target)
    loss = jax.block_until_ready(loss)

    ref = jnp.mean(jnp.log(1.0 + jnp.exp(-target.reshape(-1, 1) * output)))
    assert jnp.allclose(loss, ref, rtol=1e-5, atol=1e-5), (loss, ref)

    # second case: already-2D matching shapes, non-divisible element count
    output2 = jax.random.normal(k3, (3, 5), dtype=jnp.float32)
    target2 = jnp.where(
        jax.random.bernoulli(k4, 0.5, (3, 5)), 1.0, -1.0
    ).astype(jnp.float32)
    loss2 = jax.block_until_ready(soft_logit_loss(output2, target2))
    ref2 = jnp.mean(jnp.log(1.0 + jnp.exp(-target2 * output2)))
    assert jnp.allclose(loss2, ref2, rtol=1e-5, atol=1e-5), (loss2, ref2)

    print("KERNEL_OK")
</pallas_src>

<mosaic_0001>
module attributes {stable_mosaic.version = 11 : i64} {
  func.func @_soft_logit_kernel(%arg0: i32, %arg1: memref<8x512xf32, #tpu.memory_space<vmem>>, %arg2: memref<8x512xf32, #tpu.memory_space<vmem>>, %arg3: memref<1x8x512xf32, #tpu.memory_space<vmem>>) attributes {dimension_semantics = [#tpu.dimension_semantics<parallel>], iteration_bounds = array<i64: 1>, scalar_prefetch = 0 : i64, scratch_operands = 0 : i64, tpu.core_type = #tpu.core_type<tc>, window_params = [{transform_indices = @transform_0, window_bounds = array<i64: 8, 512>}, {transform_indices = @transform_1, window_bounds = array<i64: 8, 512>}, {transform_indices = @transform_2, window_bounds = array<i64: 1, 8, 512>}]} {
    %c0 = arith.constant 0 : index
    %c0_0 = arith.constant 0 : index
    %0 = vector.load %arg1[%c0, %c0_0] : memref<8x512xf32, #tpu.memory_space<vmem>>, vector<8x512xf32>
    %c0_1 = arith.constant 0 : index
    %c0_2 = arith.constant 0 : index
    %1 = vector.load %arg2[%c0_1, %c0_2] : memref<8x512xf32, #tpu.memory_space<vmem>>, vector<8x512xf32>
    %2 = arith.mulf %1, %0 : vector<8x512xf32>
    %cst = arith.constant 0.000000e+00 : f32
    %3 = vector.broadcast %cst : f32 to vector<8x512xf32>
    %4 = arith.subf %3, %2 : vector<8x512xf32>
    %cst_3 = arith.constant 0.000000e+00 : f32
    %5 = vector.broadcast %cst_3 : f32 to vector<8x512xf32>
    %6 = arith.maximumf %4, %5 : vector<8x512xf32>
    %7 = math.absf %4 : vector<8x512xf32>
    %cst_4 = arith.constant 0.000000e+00 : f32
    %8 = vector.broadcast %cst_4 : f32 to vector<8x512xf32>
    %9 = arith.subf %8, %7 : vector<8x512xf32>
    %10 = math.exp %9 : vector<8x512xf32>
    %11 = math.log1p %10 : vector<8x512xf32>
    %12 = arith.addf %6, %11 : vector<8x512xf32>
    %13 = vector.shape_cast %12 : vector<8x512xf32> to vector<1x8x512xf32>
    %cst_5 = arith.constant dense<0.000000e+00> : vector<8x512xf32>
    %14 = vector.multi_reduction <add>, %13, %cst_5 [0] : vector<1x8x512xf32> to vector<8x512xf32>
    %c0_6 = arith.constant 0 : index
    %c0_7 = arith.constant 0 : index
    %c0_8 = arith.constant 0 : index
    %15 = vector.load %arg3[%c0_6, %c0_7, %c0_8] : memref<1x8x512xf32, #tpu.memory_space<vmem>>, vector<1x8x512xf32>
    %16 = vector.shape_cast %15 : vector<1x8x512xf32> to vector<8x512xf32>
    %17 = vector.shape_cast %14 : vector<8x512xf32> to vector<1x8x512xf32>
    tpu.vector_store %arg3[%c0_6, %c0_7, %c0_8], %17 {strides = array<i32>} : memref<1x8x512xf32, #tpu.memory_space<vmem>>, vector<1x8x512xf32>,
    return
  }
  func.func @transform_0(%arg0: i32) -> (i32, i32) {
    %c0_i32 = arith.constant 0 : i32
    %c0_i32_0 = arith.constant 0 : i32
    return %arg0, %c0_i32 : i32, i32
  }
  func.func @transform_1(%arg0: i32) -> (i32, i32) {
    %c0_i32 = arith.constant 0 : i32
    %c0_i32_0 = arith.constant 0 : i32
    return %arg0, %c0_i32 : i32, i32
  }
  func.func @transform_2(%arg0: i32) -> (i32, i32, i32) {
    %c0_i32 = arith.constant 0 : i32
    %c0_i32_0 = arith.constant 0 : i32
    %c0_i32_1 = arith.constant 0 : i32
    return %arg0, %c0_i32, %c0_i32_0 : i32, i32, i32
  }
}

</mosaic_0001>

<bundles_post_ra>
// kernel: tpu_custom_call.1
= control target key start
LH: loop header
LB: loop body
LE: loop exit
PB: predicated region body
PF: predicated region fallthrough
CT: control target
= control target key end

     0   :  { %7 = vsyncpa [#allocation3], 0  ;;  %s257_s0 = inlined_call_operand.hbm [shape: f32[8,512], index: 0, kind: input, shape index: {}]   ;;  %s258_s1 = inlined_call_operand.hbm [shape: f32[8,512], index: 1, kind: input, shape index: {}]   ;;  %s259_s2 = inlined_call_operand.hbm [shape: f32[1,8,512], index: 2, kind: output, shape index: {}]  }
   0x1   :  { %8 = vsyncpa [#allocation6], 0 }
   0x2   :  { %9 = vsyncpa [#allocation4], 0  ;;  %s221_s9 = smov [#allocation2]   ;;  %s222_s11 = smov [#allocation5]  }
   0x3   :  { %s16_s10 = sshll.u32 %s221_s9, 4  ;;  %s26_s12 = sshll.u32 %s222_s11, 4  ;;  %s17_s10 = int_to_ptr.vmem [resolvable:$true] %s16_s10  ;;  %s27_s12 = int_to_ptr.vmem [resolvable:$true] %s26_s12 }
   0x4   :  { %s163_s13 = scalar_lea.vmem %s17_s10, 512  ;;  %p168_p1 = scmp.lt.s32.totalorder %s17_s10, %s17_s10 }
   0x5   :  { %p164_p0 = scmp.ne.s32.totalorder %s17_s10, %s163_s13  ;;  %p169_p2 = scmp.lt.s32.totalorder %s163_s13, %s163_s13 }
   0x7   :  { %p170_p3 = por %p169_p2, %p168_p1 }
   0x9   :  { %p171_p4 = pnand %p170_p3, %p164_p0 }
   0xb   :  { %174 = shalt.err (!%p171_p4)
}
   0xc   :  { %19 = dma.hbm_to_vmem [thread:$0]  %s257_s0, 512, %s17_s10, [#allocation3]  }
   0xd   :  { %s183_s16 = scalar_lea.vmem %s27_s12, 512  ;;  %p188_p6 = scmp.lt.s32.totalorder %s27_s12, %s27_s12 }
   0xe   :  { %p184_p5 = scmp.ne.s32.totalorder %s27_s12, %s183_s16  ;;  %p189_p7 = scmp.lt.s32.totalorder %s183_s16, %s183_s16 }
  0x10   :  { %p190_p8 = por %p189_p7, %p188_p6 }
  0x12   :  { %p191_p9 = pnand %p190_p8, %p184_p5 }
  0x14   :  { %194 = shalt.err (!%p191_p9)
}
  0x15   :  { %29 = dma.hbm_to_vmem [thread:$0]  %s258_s1, 512, %s27_s12, [#allocation6]  }
  0x16   :  { %215 = dma.done.wait [#allocation3], 512  }
  0x17   :  { %216 = vsyncadd [#allocation3], 4294966784 }
  0x18   :  { %217 = dma.done.wait [#allocation6], 512  }
  0x19   :  { %218 = vsyncadd [#allocation6], 4294966784  ;;  %v36_v0 = vld [vmem:[#allocation2] sm:$0xff]  ;;  %v37_v2 = vld [vmem:[#allocation2 + $0x8] sm:$0xff]  ;;  %s223_s0 = smov [#allocation7]  }
  0x1a   :  { %v40_v1 = vld [vmem:[#allocation5] sm:$0xff]  ;;  %v41_v4 = vld [vmem:[#allocation5 + $0x8] sm:$0xff]  ;;  %v38_v5 = vld [vmem:[#allocation2 + $0x10] sm:$0xff]  ;;  %s126_s1 = sshll.u32 %s223_s0, 4  ;;  %s127_s1 = int_to_ptr.vmem [resolvable:$true] %s126_s1 }
  0x1b   :  { %v44_v3 = vmul.f32 %v40_v1, %v36_v0  ;;  %v42_v6 = vld [vmem:[#allocation5 + $0x10] sm:$0xff]  ;;  %v45_v7 = vmul.f32 %v41_v4, %v37_v2  ;;  %v39_v9 = vld [vmem:[#allocation2 + $0x18] sm:$0xff]  ;;  %s195_s19 = scalar_lea.vmem %s127_s1, 512  ;;  %p200_p11 = scmp.lt.s32.totalorder %s127_s1, %s127_s1 }
  0x1c   :  { %v46_v8 = vmul.f32 %v42_v6, %v38_v5  ;;  %v43_v10 = vld [vmem:[#allocation5 + $0x18] sm:$0xff]  ;;  %p196_p10 = scmp.ne.s32.totalorder %s127_s1, %s195_s19  ;;  %p201_p12 = scmp.lt.s32.totalorder %s195_s19, %s195_s19 }
  0x1d   :  { %v48_v11 = vsub.f32 0.0, %v44_v3  ;;  %v245_v12 = vmul.f32 %v43_v10, %v39_v9  ;;  %v49_v13 = vsub.f32 0.0, %v45_v7 }
  0x1e   :  { %v50_v14 = vsub.f32 0.0, %v46_v8  ;;  %p202_p13 = por %p201_p12, %p200_p11 }
  0x1f   :  { %v56_v15 = vand.u32 2147483647, %v48_v11  ;;  %v51_v16 = vsub.f32 0.0, %v245_v12  ;;  %v57_v17 = vand.u32 2147483647, %v49_v13  ;;  %v52_v49 = vmax.f32 %v48_v11, 0.0 }
  0x20   :  { %v58_v18 = vand.u32 2147483647, %v50_v14  ;;  %v53_v55 = vmax.f32 %v49_v13, 0.0  ;;  %v54_v59 = vmax.f32 %v50_v14, 0.0  ;;  %p203_p0 = pnand %p202_p13, %p196_p10 }
  0x21   :  { %v60_v19 = vsub.f32 0.0, %v56_v15  ;;  %v59_v20 = vand.u32 2147483647, %v51_v16  ;;  %v61_v21 = vsub.f32 0.0, %v57_v17  ;;  %v55_v2 = vmax.f32 %v51_v16, 0.0 }
  0x22   :  { %v62_v22 = vsub.f32 0.0, %v58_v18 }
  0x23   :  { %v64_v23 = vmul.f32 1.442695, %v60_v19  ;;  %v63_v24 = vsub.f32 0.0, %v59_v20  ;;  %v66_v25 = vmul.f32 1.442695, %v61_v21 }
  0x24   :  { %v68_v26 = vmul.f32 1.442695, %v62_v22 }
  0x25   :  { %139 = vpow2.f32 %v64_v23  ;;  %v70_v27 = vmul.f32 1.442695, %v63_v24 }
  0x26   :  { %141 = vpow2.f32 %v66_v25 }
  0x27   :  { %143 = vpow2.f32 %v68_v26 }
  0x28   :  { %145 = vpow2.f32 %v70_v27 }
  0x32   :  { %v140_v28 = vpop.eup %139 }
  0x33   :  { %v142_v29 = vpop.eup %141  ;;  %v72_v30 = vadd.f32 1.0, %v140_v28  ;;  %v75_v36 = vmul.f32 -0.5, %v140_v28  ;;  %v78_v41 = vand.u32 2147483647, %v140_v28 }
  0x34   :  { %v144_v31 = vpop.eup %143  ;;  %v81_v32 = vadd.f32 1.0, %v142_v29  ;;  %v84_v37 = vmul.f32 -0.5, %v142_v29  ;;  %v87_v43 = vand.u32 2147483647, %v142_v29 }
  0x35   :  { %v146_v33 = vpop.eup %145  ;;  %147 = vlog2.f32 %v72_v30  ;;  %v90_v34 = vadd.f32 1.0, %v144_v31  ;;  %v93_v38 = vmul.f32 -0.5, %v144_v31  ;;  %v76_v39 = vadd.f32 1.0, %v75_v36 }
  0x36   :  { %149 = vlog2.f32 %v81_v32  ;;  %v99_v35 = vadd.f32 1.0, %v146_v33  ;;  %v102_v40 = vmul.f32 -0.5, %v146_v33  ;;  %v85_v42 = vadd.f32 1.0, %v84_v37 }
  0x37   :  { %151 = vlog2.f32 %v90_v34  ;;  %v94_v44 = vadd.f32 1.0, %v93_v38  ;;  %v96_v45 = vand.u32 2147483647, %v144_v31  ;;  %v77_v46 = vmul.f32 %v140_v28, %v76_v39 }
  0x38   :  { %153 = vlog2.f32 %v99_v35  ;;  %v103_v47 = vadd.f32 1.0, %v102_v40  ;;  %vm248_vm0 = vcmp.lt.f32.partialorder %v78_v41, 0.0004427343  ;;  %v86_v51 = vmul.f32 %v142_v29, %v85_v42 }
  0x39   :  { %v105_v52 = vand.u32 2147483647, %v146_v33  ;;  %vm88_vm1 = vcmp.lt.f32.partialorder %v87_v43, 0.0004427343  ;;  %v95_v56 = vmul.f32 %v144_v31, %v94_v44  ;;  %vm97_vm2 = vcmp.lt.f32.partialorder %v96_v45, 0.0004427343 }
  0x3a   :  { %v104_v62 = vmul.f32 %v146_v33, %v103_v47 }
  0x3b   :  { %vm106_vm3 = vcmp.lt.f32.partialorder %v105_v52, 0.0004427343 }
  0x42   :  { %v148_v48 = vpop.eup %147 }
  0x43   :  { %v150_v53 = vpop.eup %149  ;;  %v74_v54 = vmul.f32 0.6931472, %v148_v48 }
  0x44   :  { %v152_v57 = vpop.eup %151  ;;  %v83_v58 = vmul.f32 0.6931472, %v150_v53 }
  0x45   :  { %v80_v60 = vsel %vm248_vm0, %v77_v46, %v74_v54  ;;  %v92_v61 = vmul.f32 0.6931472, %v152_v57  ;;  %v154_v63 = vpop.eup %153 }
  0x46   :  { %v108_v0 = vadd.f32 %v80_v60, %v52_v49  ;;  %v89_v1 = vsel %vm88_vm1, %v86_v51, %v83_v58  ;;  %v101_v5 = vmul.f32 0.6931472, %v154_v63 }
  0x47   :  { %v109_v3 = vadd.f32 %v89_v1, %v53_v55  ;;  %v98_v4 = vsel %vm97_vm2, %v95_v56, %v92_v61 }
  0x48   :  { %116 = vst [vmem:[#allocation7] sm:$0xff] %v108_v0  ;;  %v110_v6 = vadd.f32 %v98_v4, %v54_v59  ;;  %v107_v7 = vsel %vm106_vm3, %v104_v62, %v101_v5 }
  0x49   :  { %117 = vst [vmem:[#allocation7 + $0x8] sm:$0xff] %v109_v3  ;;  %v111_v8 = vadd.f32 %v107_v7, %v55_v2 }
  0x4a   :  { %118 = vst [vmem:[#allocation7 + $0x10] sm:$0xff] %v110_v6 }
  0x4b   :  { %119 = vst [vmem:[#allocation7 + $0x18] sm:$0xff] %v111_v8 }
  0x4c   :  { %206 = shalt.err (!%p203_p0)
}
  0x4d   :  { %129 = dma.vmem_to_hbm [thread:$0]  %s127_s1, 512, %s259_s2, [#allocation4]  }
  0x4e   :  { %219 = dma.done.wait [#allocation4], 512  }
  0x4f   :  { %220 = vsyncadd [#allocation4], 4294966784 }
  0x50   :  { %133 = vsyncpa [#allocation3], 1 }
  0x51   :  { %134 = vsyncpa [#allocation6], 1 }
  0x52   :  { %135 = vsyncpa [#allocation4], 1 }

</bundles_post_ra>
